<compile_context>
chip_gen: v5e
topology: v5e:2x2
jax: 0.10.0
libtpu: 0.0.40
codegen_flags: <defaults>
</compile_context>

<pallas_src>
import jax
import jax.numpy as jnp
from jax.experimental import pallas as pl
from jax.experimental.pallas import tpu as pltpu


def conv1x1_kernel(w_ref, b_ref, x_ref, o_ref):
    # w_ref: (C_out, C_in) f32 in SMEM (scalars)
    # b_ref: (C_out,)      f32 in SMEM (scalars)
    # x_ref: (1, C_in, thw)  VMEM, lane axis = pixels (thw is a multiple of 128)
    # o_ref: (1, C_out, thw) VMEM, lane-dense unmasked stores
    C_out, C_in = w_ref.shape
    # Hoist the C_in input rows once (static slices of the ref view).
    xs = [x_ref[0, ci, :] for ci in range(C_in)]
    for co in range(C_out):
        acc = xs[0] * w_ref[co, 0] + b_ref[co]
        for ci in range(1, C_in):
            acc = acc + xs[ci] * w_ref[co, ci]
        o_ref[0, co, :] = acc.astype(o_ref.dtype)


def outconv_orig_forward(x, weight, bias, *, tile_hw=8192):
    """1x1 conv forward, identical semantics to nn.Conv2d(in_ch, out_ch, 1).

    x:      (N, C_in, H, W)
    weight: (C_out, C_in, 1, 1)
    bias:   (C_out,)
    returns (N, C_out, H, W)
    """
    N, C_in, H, W = x.shape
    C_out = weight.shape[0]
    HW = H * W

    def round_up(a, b):
        return (a + b - 1) // b * b

    # Lane-dense pixel tile: multiple of 128, capped so per-step DMA stays
    # comfortably above the ~0.35us grid-step overhead without stressing VMEM.
    thw = min(round_up(HW, 128), tile_hw)
    HW_pad = round_up(HW, thw)

    # Free view (contiguous trailing dims merge); no NCHW<->NHWC transpose.
    x3 = x.reshape(N, C_in, HW)
    if HW_pad != HW:
        x3 = jnp.pad(x3, ((0, 0), (0, 0), (0, HW_pad - HW)))

    w2 = weight.reshape(C_out, C_in)
    b1 = bias.reshape(C_out)

    grid = (N, HW_pad // thw)

    out = pl.pallas_call(
        conv1x1_kernel,
        out_shape=jax.ShapeDtypeStruct((N, C_out, HW_pad), x.dtype),
        grid_spec=pltpu.PrefetchScalarGridSpec(
            num_scalar_prefetch=0,
            grid=grid,
            in_specs=[
                pl.BlockSpec(memory_space=pltpu.MemorySpace.SMEM),   # weights (scalars)
                pl.BlockSpec(memory_space=pltpu.MemorySpace.SMEM),   # bias    (scalars)
                pl.BlockSpec((1, C_in, thw), lambda n, t: (n, 0, t)),  # pixels, lane-dense
            ],
            out_specs=pl.BlockSpec((1, C_out, thw), lambda n, t: (n, 0, t)),
        ),
        compiler_params=pltpu.CompilerParams(
            # Both grid axes are independent -> shardable across TCs (v7x megacore).
            dimension_semantics=("parallel", "parallel"),
        ),
    )(w2, b1, x3)

    if HW_pad != HW:
        out = out[:, :, :HW]
    return out.reshape(N, C_out, H, W)


if __name__ == "__main__":
    # Small shapes consistent with the module: batch=2, in_ch=4, out_ch=3, 16x16 spatial.
    N, in_ch, out_ch, Hs, Ws = 2, 4, 3, 16, 16

    key = jax.random.PRNGKey(0)
    kx, kw, kb = jax.random.split(key, 3)

    x = jax.random.normal(kx, (N, in_ch, Hs, Ws), dtype=jnp.float32)
    # Deterministic param init (uniform ~ PyTorch default scale 1/sqrt(fan_in))
    bound = 1.0 / jnp.sqrt(jnp.float32(in_ch))
    weight = jax.random.uniform(kw, (out_ch, in_ch, 1, 1), jnp.float32, -bound, bound)
    bias = jax.random.uniform(kb, (out_ch,), jnp.float32, -bound, bound)

    y = outconv_orig_forward(x, weight, bias)
    y = jax.block_until_ready(y)

    # Sanity check against a pure-JAX reference (1x1 conv == einsum over channels)
    y_ref = jnp.einsum("nchw,oc->nohw", x, weight.reshape(out_ch, in_ch)) + bias[None, :, None, None]
    assert y.shape == (N, out_ch, Hs, Ws)
    assert jnp.allclose(y, y_ref, atol=1e-5, rtol=1e-5)

    print("KERNEL_OK")
</pallas_src>

<mosaic_0001>
module attributes {stable_mosaic.version = 11 : i64} {
  func.func @conv1x1_kernel(%arg0: i32, %arg1: i32, %arg2: memref<3x4xf32, #tpu.memory_space<smem>>, %arg3: memref<3xf32, #tpu.memory_space<smem>>, %arg4: memref<1x4x256xf32, #tpu.memory_space<vmem>>, %arg5: memref<1x3x256xf32, #tpu.memory_space<vmem>>) attributes {dimension_semantics = [#tpu.dimension_semantics<parallel>, #tpu.dimension_semantics<parallel>], iteration_bounds = array<i64: 2, 1>, scalar_prefetch = 0 : i64, scratch_operands = 0 : i64, tpu.core_type = #tpu.core_type<tc>, window_params = [{transform_indices = @transform_0, window_bounds = array<i64: 3, 4>}, {transform_indices = @transform_1, window_bounds = array<i64: 3>}, {transform_indices = @transform_2, window_bounds = array<i64: 1, 4, 256>}, {transform_indices = @transform_3, window_bounds = array<i64: 1, 3, 256>}]} {
    %c0 = arith.constant 0 : index
    %c0_0 = arith.constant 0 : index
    %c0_1 = arith.constant 0 : index
    %0 = vector.load %arg4[%c0, %c0_0, %c0_1] : memref<1x4x256xf32, #tpu.memory_space<vmem>>, vector<1x1x256xf32>
    %1 = vector.shape_cast %0 : vector<1x1x256xf32> to vector<256xf32>
    %c0_2 = arith.constant 0 : index
    %c1 = arith.constant 1 : index
    %c0_3 = arith.constant 0 : index
    %2 = vector.load %arg4[%c0_2, %c1, %c0_3] : memref<1x4x256xf32, #tpu.memory_space<vmem>>, vector<1x1x256xf32>
    %3 = vector.shape_cast %2 : vector<1x1x256xf32> to vector<256xf32>
    %c0_4 = arith.constant 0 : index
    %c2 = arith.constant 2 : index
    %c0_5 = arith.constant 0 : index
    %4 = vector.load %arg4[%c0_4, %c2, %c0_5] : memref<1x4x256xf32, #tpu.memory_space<vmem>>, vector<1x1x256xf32>
    %5 = vector.shape_cast %4 : vector<1x1x256xf32> to vector<256xf32>
    %c0_6 = arith.constant 0 : index
    %c3 = arith.constant 3 : index
    %c0_7 = arith.constant 0 : index
    %6 = vector.load %arg4[%c0_6, %c3, %c0_7] : memref<1x4x256xf32, #tpu.memory_space<vmem>>, vector<1x1x256xf32>
    %7 = vector.shape_cast %6 : vector<1x1x256xf32> to vector<256xf32>
    %c0_8 = arith.constant 0 : index
    %c0_9 = arith.constant 0 : index
    %8 = memref.load %arg2[%c0_8, %c0_9] : memref<3x4xf32, #tpu.memory_space<smem>>
    %9 = vector.broadcast %8 : f32 to vector<256xf32>
    %10 = arith.mulf %1, %9 : vector<256xf32>
    %c0_10 = arith.constant 0 : index
    %11 = memref.load %arg3[%c0_10] : memref<3xf32, #tpu.memory_space<smem>>
    %12 = vector.broadcast %11 : f32 to vector<256xf32>
    %13 = arith.addf %10, %12 : vector<256xf32>
    %c0_11 = arith.constant 0 : index
    %c1_12 = arith.constant 1 : index
    %14 = memref.load %arg2[%c0_11, %c1_12] : memref<3x4xf32, #tpu.memory_space<smem>>
    %15 = vector.broadcast %14 : f32 to vector<256xf32>
    %16 = arith.mulf %3, %15 : vector<256xf32>
    %17 = arith.addf %13, %16 : vector<256xf32>
    %c0_13 = arith.constant 0 : index
    %c2_14 = arith.constant 2 : index
    %18 = memref.load %arg2[%c0_13, %c2_14] : memref<3x4xf32, #tpu.memory_space<smem>>
    %19 = vector.broadcast %18 : f32 to vector<256xf32>
    %20 = arith.mulf %5, %19 : vector<256xf32>
    %21 = arith.addf %17, %20 : vector<256xf32>
    %c0_15 = arith.constant 0 : index
    %c3_16 = arith.constant 3 : index
    %22 = memref.load %arg2[%c0_15, %c3_16] : memref<3x4xf32, #tpu.memory_space<smem>>
    %23 = vector.broadcast %22 : f32 to vector<256xf32>
    %24 = arith.mulf %7, %23 : vector<256xf32>
    %25 = arith.addf %21, %24 : vector<256xf32>
    %c0_17 = arith.constant 0 : index
    %c0_18 = arith.constant 0 : index
    %c0_19 = arith.constant 0 : index
    %26 = vector.load %arg5[%c0_17, %c0_18, %c0_19] : memref<1x3x256xf32, #tpu.memory_space<vmem>>, vector<1x1x256xf32>
    %27 = vector.shape_cast %26 : vector<1x1x256xf32> to vector<256xf32>
    %28 = vector.shape_cast %25 : vector<256xf32> to vector<1x1x256xf32>
    tpu.vector_store %arg5[%c0_17, %c0_18, %c0_19], %28 {strides = array<i32>} : memref<1x3x256xf32, #tpu.memory_space<vmem>>, vector<1x1x256xf32>,
    %c1_20 = arith.constant 1 : index
    %c0_21 = arith.constant 0 : index
    %29 = memref.load %arg2[%c1_20, %c0_21] : memref<3x4xf32, #tpu.memory_space<smem>>
    %30 = vector.broadcast %29 : f32 to vector<256xf32>
    %31 = arith.mulf %1, %30 : vector<256xf32>
    %c1_22 = arith.constant 1 : index
    %32 = memref.load %arg3[%c1_22] : memref<3xf32, #tpu.memory_space<smem>>
    %33 = vector.broadcast %32 : f32 to vector<256xf32>
    %34 = arith.addf %31, %33 : vector<256xf32>
    %c1_23 = arith.constant 1 : index
    %c1_24 = arith.constant 1 : index
    %35 = memref.load %arg2[%c1_23, %c1_24] : memref<3x4xf32, #tpu.memory_space<smem>>
    %36 = vector.broadcast %35 : f32 to vector<256xf32>
    %37 = arith.mulf %3, %36 : vector<256xf32>
    %38 = arith.addf %34, %37 : vector<256xf32>
    %c1_25 = arith.constant 1 : index
    %c2_26 = arith.constant 2 : index
    %39 = memref.load %arg2[%c1_25, %c2_26] : memref<3x4xf32, #tpu.memory_space<smem>>
    %40 = vector.broadcast %39 : f32 to vector<256xf32>
    %41 = arith.mulf %5, %40 : vector<256xf32>
    %42 = arith.addf %38, %41 : vector<256xf32>
    %c1_27 = arith.constant 1 : index
    %c3_28 = arith.constant 3 : index
    %43 = memref.load %arg2[%c1_27, %c3_28] : memref<3x4xf32, #tpu.memory_space<smem>>
    %44 = vector.broadcast %43 : f32 to vector<256xf32>
    %45 = arith.mulf %7, %44 : vector<256xf32>
    %46 = arith.addf %42, %45 : vector<256xf32>
    %c0_29 = arith.constant 0 : index
    %c1_30 = arith.constant 1 : index
    %c0_31 = arith.constant 0 : index
    %47 = vector.load %arg5[%c0_29, %c1_30, %c0_31] : memref<1x3x256xf32, #tpu.memory_space<vmem>>, vector<1x1x256xf32>
    %48 = vector.shape_cast %47 : vector<1x1x256xf32> to vector<256xf32>
    %49 = vector.shape_cast %46 : vector<256xf32> to vector<1x1x256xf32>
    tpu.vector_store %arg5[%c0_29, %c1_30, %c0_31], %49 {strides = array<i32>} : memref<1x3x256xf32, #tpu.memory_space<vmem>>, vector<1x1x256xf32>,
    %c2_32 = arith.constant 2 : index
    %c0_33 = arith.constant 0 : index
    %50 = memref.load %arg2[%c2_32, %c0_33] : memref<3x4xf32, #tpu.memory_space<smem>>
    %51 = vector.broadcast %50 : f32 to vector<256xf32>
    %52 = arith.mulf %1, %51 : vector<256xf32>
    %c2_34 = arith.constant 2 : index
    %53 = memref.load %arg3[%c2_34] : memref<3xf32, #tpu.memory_space<smem>>
    %54 = vector.broadcast %53 : f32 to vector<256xf32>
    %55 = arith.addf %52, %54 : vector<256xf32>
    %c2_35 = arith.constant 2 : index
    %c1_36 = arith.constant 1 : index
    %56 = memref.load %arg2[%c2_35, %c1_36] : memref<3x4xf32, #tpu.memory_space<smem>>
    %57 = vector.broadcast %56 : f32 to vector<256xf32>
    %58 = arith.mulf %3, %57 : vector<256xf32>
    %59 = arith.addf %55, %58 : vector<256xf32>
    %c2_37 = arith.constant 2 : index
    %c2_38 = arith.constant 2 : index
    %60 = memref.load %arg2[%c2_37, %c2_38] : memref<3x4xf32, #tpu.memory_space<smem>>
    %61 = vector.broadcast %60 : f32 to vector<256xf32>
    %62 = arith.mulf %5, %61 : vector<256xf32>
    %63 = arith.addf %59, %62 : vector<256xf32>
    %c2_39 = arith.constant 2 : index
    %c3_40 = arith.constant 3 : index
    %64 = memref.load %arg2[%c2_39, %c3_40] : memref<3x4xf32, #tpu.memory_space<smem>>
    %65 = vector.broadcast %64 : f32 to vector<256xf32>
    %66 = arith.mulf %7, %65 : vector<256xf32>
    %67 = arith.addf %63, %66 : vector<256xf32>
    %c0_41 = arith.constant 0 : index
    %c2_42 = arith.constant 2 : index
    %c0_43 = arith.constant 0 : index
    %68 = vector.load %arg5[%c0_41, %c2_42, %c0_43] : memref<1x3x256xf32, #tpu.memory_space<vmem>>, vector<1x1x256xf32>
    %69 = vector.shape_cast %68 : vector<1x1x256xf32> to vector<256xf32>
    %70 = vector.shape_cast %67 : vector<256xf32> to vector<1x1x256xf32>
    tpu.vector_store %arg5[%c0_41, %c2_42, %c0_43], %70 {strides = array<i32>} : memref<1x3x256xf32, #tpu.memory_space<vmem>>, vector<1x1x256xf32>,
    return
  }
  func.func @transform_0(%arg0: i32, %arg1: i32) -> (i32, i32) {
    %c0_i32 = arith.constant 0 : i32
    %c0_i32_0 = arith.constant 0 : i32
    %c0_i32_1 = arith.constant 0 : i32
    return %c0_i32, %c0_i32_0 : i32, i32
  }
  func.func @transform_1(%arg0: i32, %arg1: i32) -> i32 {
    %c0_i32 = arith.constant 0 : i32
    %c0_i32_0 = arith.constant 0 : i32
    return %c0_i32 : i32
  }
  func.func @transform_2(%arg0: i32, %arg1: i32) -> (i32, i32, i32) {
    %c0_i32 = arith.constant 0 : i32
    %c0_i32_0 = arith.constant 0 : i32
    return %arg0, %c0_i32, %arg1 : i32, i32, i32
  }
  func.func @transform_3(%arg0: i32, %arg1: i32) -> (i32, i32, i32) {
    %c0_i32 = arith.constant 0 : i32
    %c0_i32_0 = arith.constant 0 : i32
    return %arg0, %c0_i32, %arg1 : i32, i32, i32
  }
}

</mosaic_0001>

<bundles_post_ra>
// kernel: tpu_custom_call.1
= control target key start
LH: loop header
LB: loop body
LE: loop exit
PB: predicated region body
PF: predicated region fallthrough
CT: control target
= control target key end

     0   :  { %8 = vsyncpa [#allocation4], 0  ;;  %s821_s0 = inlined_call_operand.hbm [shape: f32[3,4], index: 0, kind: input, shape index: {}]   ;;  %s822_s1 = inlined_call_operand.hbm [shape: f32[3], index: 1, kind: input, shape index: {}]   ;;  %s823_s2 = inlined_call_operand.hbm [shape: f32[2,4,256], index: 2, kind: input, shape index: {}]   ;;  %s824_s3 = inlined_call_operand.vmem [shape: f32[2,3,256], index: 3, kind: output, shape index: {}]  }
   0x1   :  { %9 = vsyncpa [#allocation6], 0 }
   0x2   :  { %10 = vsyncpa [#allocation3], 0 }
   0x3   :  { %12 = vsyncpa [#allocation3 + $0x1], 0  ;;  %s688_s12 = smov 0   ;;  %s690_s13 = smov 0  }
   0x4   :  { %s692_s14 = smov 0   ;;  %s694_s15 = smov 0  }
   0x5   :  { %s696_s16 = smov 0   ;;  %s698_s17 = smov 0  }
   0x6 LB: > { %s433_s18 = sadd.s32 4294967295, %s664_s17   ;;  %p94_p0 = scmp.ne.s32.totalorder %s648_s13, %s644_s12  ;;  %s664_s17 = sphi %s698_s17, %s18_s17   ;;  %s660_s16 = sphi %s696_s16, %s835_s16   ;;  %s656_s15 = sphi %s694_s15, %s834_s15   ;;  %s652_s14 = sphi %s692_s14, %s833_s14   ;;  %s648_s13 = sphi %s690_s13, %s832_s13   ;;  %s644_s12 = sphi %s688_s12, %s831_s12  }
   0x7   : > { %p718_p1 = scmp.eq.s32.totalorder %s433_s18, 0  ;;  %p435_p2 = scmp.ge.s32.totalorder %s664_s17, 1 }
   0x8   : > { %p133_p3 = scmp.lt.s32.totalorder %s664_s17, 3  ;;  %s145_s23 = sshll.u32 %s821_s0, 4  ;;  %s146_s23 = int_to_ptr.hbm [resolvable:$true] %s145_s23 }
   0x9   : > { %p726_p4 = por %p718_p1, %p94_p0  ;;  %s155_s27 = sshll.u32 %s822_s1, 4  ;;  %s156_s27 = int_to_ptr.hbm [resolvable:$true] %s155_s27 }
   0xa   : > { %p733_p5 = pnand %p435_p2, %p133_p3  ;;  %s666_s28 = smov [#allocation2]  }
   0xb   : > { %s667_s29 = smov [#allocation5]   ;;  %s30_s30 = sadd.s32 1, %s660_s16 }
   0xc   : > { %p480_p6 = pneg %p733_p5  ;;  %s81_s4 = sadd.s32 1, %s652_s14 }
   0xd   : > { %p32_p8 = scmp.ge.s32.totalorder %s30_s30, 2  ;;  %p88_p9 = scmp.ne.s32.totalorder %s652_s14, %s648_s13 }
   0xe   : > { %p481_p7 = pnand %p480_p6, %p718_p1  ;;  %p89_p10 = scmp.eq.s32.totalorder %s664_s17, 0 }
   0xf   : > { %p493_p11 = scmp.lt.s32.totalorder %s664_s17, 2  ;;  %s837_s30 = smov (%p32_p8, %s30_s30), 0 }
  0x10   : > { %483 = dma.hbm_to_smem (!%p481_p7), %s146_s23, 64, %s666_s28, [#allocation4]  }
  0x11   : > { %486 = dma.hbm_to_smem (!%p481_p7), %s156_s27, 16, %s667_s29, [#allocation6]  }
  0x12   : > { %p752_p12 = por %p89_p10, %p88_p9  ;;  %s166_s6 = sand.u32 1, %s652_s14  }
  0x13   : > { %s76_s7 = ssub.s32 %s660_s16, %s837_s30  ;;  %s439_s8 = sshll.u32 %s166_s6, 3 }
  0x14   : > { %p79_p13 = scmp.eq.s32.totalorder %s76_s7, 0  ;;  %s468_s9 = sshll.u32 %s660_s16, 3 }
  0x15   : > { %s177_s18 = scalar_lea.hbm %s823_s2, %s468_s9  ;;  %s170_s21 = scalar_lea.vmem [#allocation7], %s439_s8 }
  0x16   : > { %s761_s10 = scalar_select %p79_p13, %s652_s14, %s81_s4  }
  0x17   : > { %s181_s22 = sshll.u32 %s170_s21, 4  ;;  %s179_s23 = sshll.u32 %s177_s18, 4  ;;  %s182_s22 = int_to_ptr.vmem [resolvable:$true] %s181_s22  ;;  %s180_s23 = int_to_ptr.hbm [resolvable:$true] %s179_s23 }
  0x18   : > { %p488_p0 = pnand %p493_p11, %p752_p12  ;;  %s167_s25 = scalar_lea.sflag [#allocation3], %s166_s6 }
  0x19   : > { %190 = sbr.rel (%p733_p5) target bundleno = 67 (0x43), region = 32 }
  0x1a   : > { %490 = dma.hbm_to_vmem [thread:$0]  (!%p488_p0), %s180_s23, 128, %s182_s22, %s167_s25  }
  0x1e   : > { %631 = dma.done.wait (%p718_p1), [#allocation4], 64  }
  0x1f   : > { %633 = vsyncadd (%p718_p1), [#allocation4], 4294967232 }
  0x20   : > { %635 = dma.done.wait (%p718_p1), [#allocation6], 16  }
  0x21   : > { %637 = vsyncadd (%p718_p1), [#allocation6], 4294967280  ;;  %s202_s26 = sand.u32 1, %s648_s13  }
  0x22   : > { %s445_s27 = sshll.u32 %s202_s26, 3  ;;  %s203_s28 = scalar_lea.sflag [#allocation3], %s202_s26 }
  0x23   : > { %s206_s29 = scalar_lea.vmem [#allocation7], %s445_s27 }
  0x24   : > { %639 = dma.done.wait (%p726_p4), %s203_s28, 128  }
  0x25   : > { %641 = vsyncadd (%p726_p4), %s203_s28, 4294967168 }
  0x26   : > { %212 = sfence }
  0x27   : > { %p237_p2 = scmp.lt.s32.totalorder %s656_s15, 1  ;;  %s253_s24 = sld [smem:[#allocation2]]  ;;  %v246_v0 = vld [vmem:[%s206_s29] ss:$4 sm:$0x3]  ;;  %v271_v13 = vlaneseq }
  0x28   : > { %s256_s19 = sld [smem:[#allocation5]]  ;;  %v448_v3 = vld [vmem:[%s206_s29 + $0x1] ss:$4 sm:$0x3] }
  0x29   : > { %s839_s15 = smov (!%p237_p2, %s656_s15), 1  ;;  %s451_s4 = sld [smem:[#allocation2 + $0x1]]  ;;  %v449_v4 = vld [vmem:[%s206_s29 + $0x2] ss:$4 sm:$0x3]  ;;  %vm793_vm0 = vcmp.lt.s32.totalorder %v271_v13, 256 }
  0x2a   : > { %s452_s5 = sld [smem:[#allocation2 + $0x2]]  ;;  %v450_v6 = vld [vmem:[%s206_s29 + $0x3] ss:$4 sm:$0x3]  ;;  %s469_s18 = sshll.u32 %s839_s15, 3 }
  0x2b   : > { %s453_s6 = sld [smem:[#allocation2 + $0x3]]  ;;  %s244_s27 = scalar_lea.vmem %s824_s3, %s469_s18 }
  0x2c   : > { %s454_s7 = sld [smem:[#allocation2 + $0x80]] }
  0x2d   : > { %v254_v1 = vstv %s253_s24  ;;  %s455_s8 = sld [smem:[#allocation5 + $0x1]] }
  0x2e   : > { %v255_v2 = vmul.f32 %v254_v1, %v246_v0  ;;  %v257_v5 = vstv %s256_s19  ;;  %s456_s20 = sld [smem:[#allocation2 + $0x81]] }
  0x2f   : > { %v260_v8 = vstv %s451_s4  ;;  %s457_s9 = sld [smem:[#allocation2 + $0x82]] }
  0x30   : > { %v258_v7 = vadd.f32 %v257_v5, %v255_v2  ;;  %v261_v9 = vmul.f32 %v448_v3, %v260_v8  ;;  %v264_v10 = vstv %s452_s5  ;;  %s458_s11 = sld [smem:[#allocation2 + $0x83]] }
  0x31   : > { %v265_v11 = vmul.f32 %v449_v4, %v264_v10  ;;  %v268_v12 = vstv %s453_s6  ;;  %s460_s12 = sld [smem:[#allocation2 + $0x100]] }
  0x32   : > { %v262_v14 = vadd.f32 %v261_v9, %v258_v7  ;;  %v269_v15 = vmul.f32 %v450_v6, %v268_v12  ;;  %v277_v16 = vstv %s454_s7  ;;  %s461_s21 = sld [smem:[#allocation5 + $0x2]] }
  0x33   : > { %v278_v17 = vmul.f32 %v277_v16, %v246_v0  ;;  %v280_v18 = vstv %s455_s8  ;;  %s462_s22 = sld [smem:[#allocation2 + $0x101]] }
  0x34   : > { %v266_v19 = vadd.f32 %v265_v11, %v262_v14  ;;  %v283_v20 = vstv %s456_s20  ;;  %s463_s23 = sld [smem:[#allocation2 + $0x102]] }
  0x35   : > { %v281_v22 = vadd.f32 %v280_v18, %v278_v17  ;;  %v284_v23 = vmul.f32 %v448_v3, %v283_v20  ;;  %v287_v24 = vstv %s457_s9  ;;  %s464_s15 = sld [smem:[#allocation2 + $0x103]] }
  0x36   : > { %v270_v25 = vadd.f32 %v269_v15, %v266_v19  ;;  %v288_v26 = vmul.f32 %v449_v4, %v287_v24  ;;  %v291_v27 = vstv %s458_s11 }
  0x37   : > { %v285_v28 = vadd.f32 %v284_v23, %v281_v22  ;;  %v292_v29 = vmul.f32 %v450_v6, %v291_v27  ;;  %v297_v30 = vstv %s460_s12 }
  0x38   : > { %275 = vst.msk [vmem:[%s244_s27] ss:$4 sm:$0x3] %vm793_vm0, %v270_v25  ;;  %v298_v31 = vmul.f32 %v297_v30, %v246_v0  ;;  %v300_v32 = vstv %s461_s21 }
  0x39   : > { %v289_v33 = vadd.f32 %v288_v26, %v285_v28  ;;  %v303_v34 = vstv %s462_s22 }
  0x3a   : > { %v301_v35 = vadd.f32 %v300_v32, %v298_v31  ;;  %v304_v36 = vmul.f32 %v448_v3, %v303_v34  ;;  %v307_v37 = vstv %s463_s23 }
  0x3b   : > { %v293_v38 = vadd.f32 %v292_v29, %v289_v33  ;;  %v308_v39 = vmul.f32 %v449_v4, %v307_v37  ;;  %v311_v40 = vstv %s464_s15 }
  0x3c   : > { %v305_v41 = vadd.f32 %v304_v36, %v301_v35  ;;  %v312_v42 = vmul.f32 %v450_v6, %v311_v40 }
  0x3d   : > { %459 = vst.msk [vmem:[%s244_s27 + $0x1] ss:$4 sm:$0x3] %vm793_vm0, %v293_v38 }
  0x3e   : > { %v309_v43 = vadd.f32 %v308_v39, %v305_v41 }
  0x40   : > { %v313_v44 = vadd.f32 %v312_v42, %v309_v43 }
  0x42   : > { %465 = vst.msk [vmem:[%s244_s27 + $0x2] ss:$4 sm:$0x3] %vm793_vm0, %v313_v44 }
  0x43 PF: > { %s18_s17 = sadd.s32 1, %s664_s17   ;;  %s831_s12 = smov %s648_s13 }
  0x44   : > { %p15_p1 = scmp.ge.s32.totalorder %s18_s17, 4   ;;  %s832_s13 = smov %s652_s14 }
  0x45   : > { %s833_s14 = smov %s761_s10  ;;  %s834_s15 = smov %s660_s16 }
  0x46   : > { %s835_s16 = smov %s837_s30  ;;  %17 = sbr.rel (!%p15_p1) target bundleno = 6 (0x6), region = 86 }
  0x4b   :  { %346 = vsyncpa [#allocation3], 1 }
  0x4c   :  { %348 = vsyncpa [#allocation3 + $0x1], 1 }
  0x4d   :  { %349 = vsyncpa [#allocation4], 1 }
  0x4e   :  { %351 = vsyncpa [#allocation4 + $0x1], 1 }
  0x4f   :  { %352 = vsyncpa [#allocation6], 1 }

</bundles_post_ra>
